<compile_context>
chip_gen: v5e
topology: v5e:2x2
jax: 0.10.0
libtpu: 0.0.40
codegen_flags: <defaults>
</compile_context>

<pallas_src>
import jax
import jax.numpy as jnp
import numpy as np
from jax import lax
from jax.experimental import pallas as pl
from jax.experimental.pallas import tpu as pltpu


def _round_up(a, b):
    return ((a + b - 1) // b) * b


# Scoped-VMEM cap: plenty for 512-wide bf16 tiles double-buffered, well under
# v7x's 64 MiB physical VMEM, and explicitly above v5e's 16 MiB scoped default.
_VMEM_LIMIT_BYTES = 48 * 1024 * 1024


# ----------------- Kernel 1: tiled matmul + bias (parallel grid) -------------

def matmul_bias_kernel(x_ref, w_ref, b_ref, o_ref, acc_ref):
    """o = x @ w + b, accumulated over the K grid axis in f32 scratch."""
    @pl.when(pl.program_id(2) == 0)
    def _():
        acc_ref[...] = jnp.zeros_like(acc_ref)

    acc_ref[...] += jnp.dot(x_ref[...], w_ref[...],
                            preferred_element_type=jnp.float32)

    @pl.when(pl.program_id(2) == pl.num_programs(2) - 1)
    def _():
        o_ref[...] = (acc_ref[...] + b_ref[...]).astype(o_ref.dtype)


def matmul_bias(x, w, b, *, out_dtype=jnp.float32,
                tile_m=512, tile_n=512, tile_k=512):
    """(M, K) @ (K, N) + (N,) -> (M, N). bf16 operands recommended; f32 accumulation.
    Pads to tile multiples and slices back."""
    M, K = x.shape
    Kw, N = w.shape
    assert K == Kw and b.shape == (N,)

    tm = min(tile_m, _round_up(M, 8))
    tn = min(tile_n, _round_up(N, 128))   # as wide as possible: lane-dense stores
    tk = min(tile_k, _round_up(K, 128))
    M_pad, K_pad, N_pad = _round_up(M, tm), _round_up(K, tk), _round_up(N, tn)

    x_p = jnp.pad(x, ((0, M_pad - M), (0, K_pad - K))) if (M_pad, K_pad) != (M, K) else x
    w_p = jnp.pad(w, ((0, K_pad - K), (0, N_pad - N))) if (K_pad, N_pad) != (K, N) else w
    b_p = (jnp.pad(b, (0, N_pad - N)) if N_pad != N else b).astype(jnp.float32)
    b_p = b_p.reshape(1, N_pad)

    grid = (M_pad // tm, N_pad // tn, K_pad // tk)

    out = pl.pallas_call(
        matmul_bias_kernel,
        out_shape=jax.ShapeDtypeStruct((M_pad, N_pad), out_dtype),
        grid_spec=pltpu.PrefetchScalarGridSpec(
            num_scalar_prefetch=0,
            grid=grid,
            in_specs=[
                pl.BlockSpec((tm, tk), lambda i, j, k: (i, k)),
                pl.BlockSpec((tk, tn), lambda i, j, k: (k, j)),
                pl.BlockSpec((1, tn), lambda i, j, k: (0, j)),
            ],
            out_specs=pl.BlockSpec((tm, tn), lambda i, j, k: (i, j)),
            scratch_shapes=[pltpu.VMEM((tm, tn), jnp.float32)],
        ),
        compiler_params=pltpu.CompilerParams(
            dimension_semantics=("parallel", "parallel", "arbitrary"),
            vmem_limit_bytes=_VMEM_LIMIT_BYTES),
    )(x_p, w_p, b_p)

    if (M_pad, N_pad) != (M, N):
        out = out[:M, :N]
    return out


# --------- Kernel 2: LSTM recurrence (sequential over timestep blocks) -------

def lstm_recurrence_kernel(gate_ref, w_hh_t_ref, h_out_ref, h_scr, c_scr):
    """One grid step = t_blk LSTM timesteps for one batch block.

    Grid = (batch_blocks [parallel], time_blocks [arbitrary, sequential]).
    gate_ref  : (t_blk, b_blk, 4H) bf16  precomputed x@W_ih^T + (b_ih + b_hh)
    w_hh_t_ref: (H, 4H)            bf16  hidden-to-hidden weights (pre-transposed)
    h_out_ref : (t_blk, b_blk, H)  bf16  hidden states for these timesteps
    h_scr,c_scr: (b_blk, H)        f32   recurrent state, persists across time blocks
    """
    @pl.when(pl.program_id(1) == 0)          # new batch block -> reset h/c state
    def _():
        h_scr[...] = jnp.zeros_like(h_scr)
        c_scr[...] = jnp.zeros_like(c_scr)

    H = h_scr.shape[1]
    t_blk = gate_ref.shape[0]
    unroll = 8 if t_blk % 8 == 0 else (4 if t_blk % 4 == 0 else (2 if t_blk % 2 == 0 else 1))

    def step(tt, carry):
        h = h_scr[...]
        c = c_scr[...]
        # Keep W_hh as a ref read inside the loop (don't pin 4H*H in vregs across a
        # long unroll); MXU streams it from VMEM. bf16 operands, f32 accumulation,
        # f32 gate nonlinearities (v5e has no bf16 VPU/EUP).
        gates = (gate_ref[tt].astype(jnp.float32)
                 + jnp.dot(h.astype(jnp.bfloat16), w_hh_t_ref[...],
                           preferred_element_type=jnp.float32))
        i_g = jax.nn.sigmoid(gates[:, 0 * H:1 * H])
        f_g = jax.nn.sigmoid(gates[:, 1 * H:2 * H])
        g_g = jnp.tanh(gates[:, 2 * H:3 * H])
        o_g = jax.nn.sigmoid(gates[:, 3 * H:4 * H])
        c_new = f_g * c + i_g * g_g
        h_new = o_g * jnp.tanh(c_new)
        h_scr[...] = h_new
        c_scr[...] = c_new
        h_out_ref[tt] = h_new.astype(h_out_ref.dtype)
        return carry

    lax.fori_loop(0, t_blk, step, 0, unroll=unroll)


def lstm_recurrence(gate_in, w_hh_t, *, t_blk=32):
    """gate_in: (S, B, 4H) bf16 precomputed gate inputs. Returns h_seq (S, B, H) bf16."""
    S, B, H4 = gate_in.shape
    H = H4 // 4
    t_blk = min(t_blk, S)
    S_pad = _round_up(S, t_blk)
    B_pad = _round_up(B, 8)                  # sublane-align the batch dim
    # Batch-split (parallel) leading grid axis so v7x's 2nd TensorCore can take half
    # the batch during the recurrence; only split when each half stays 8-aligned.
    b_blk = B_pad // 2 if (B_pad >= 16 and (B_pad // 2) % 8 == 0) else B_pad
    if (S_pad, B_pad) != (S, B):
        gate_in = jnp.pad(gate_in, ((0, S_pad - S), (0, B_pad - B), (0, 0)))

    h_seq = pl.pallas_call(
        lstm_recurrence_kernel,
        out_shape=jax.ShapeDtypeStruct((S_pad, B_pad, H), jnp.bfloat16),
        grid_spec=pltpu.PrefetchScalarGridSpec(
            num_scalar_prefetch=0,
            grid=(B_pad // b_blk, S_pad // t_blk),
            in_specs=[
                pl.BlockSpec((t_blk, b_blk, H4), lambda b, t: (t, b, 0)),
                pl.BlockSpec((H, H4), lambda b, t: (0, 0)),
            ],
            out_specs=pl.BlockSpec((t_blk, b_blk, H), lambda b, t: (t, b, 0)),
            scratch_shapes=[
                pltpu.VMEM((b_blk, H), jnp.float32),   # h
                pltpu.VMEM((b_blk, H), jnp.float32),   # c
            ],
        ),
        compiler_params=pltpu.CompilerParams(
            dimension_semantics=("parallel", "arbitrary"),
            vmem_limit_bytes=_VMEM_LIMIT_BYTES),
    )(gate_in, w_hh_t)

    if (S_pad, B_pad) != (S, B):
        h_seq = h_seq[:S, :B]
    return h_seq


# ------------------------------ Model wrapper ---------------------------------

def init_params(key, vocab_size, embedding_dim, hidden_size):
    """PyTorch-layout f32 parameters (used by the reference)."""
    ks = jax.random.split(key, 7)
    k_hh = 1.0 / np.sqrt(hidden_size)
    return {
        "embedding": jax.random.normal(ks[0], (vocab_size, embedding_dim), jnp.float32),
        "w_ih": jax.random.uniform(ks[1], (4 * hidden_size, embedding_dim),
                                   jnp.float32, -k_hh, k_hh),
        "w_hh": jax.random.uniform(ks[2], (4 * hidden_size, hidden_size),
                                   jnp.float32, -k_hh, k_hh),
        "b_ih": jax.random.uniform(ks[3], (4 * hidden_size,), jnp.float32, -k_hh, k_hh),
        "b_hh": jax.random.uniform(ks[4], (4 * hidden_size,), jnp.float32, -k_hh, k_hh),
        "w_fc": jax.random.uniform(ks[5], (vocab_size, hidden_size),
                                   jnp.float32, -k_hh, k_hh),
        "b_fc": jax.random.uniform(ks[6], (vocab_size,), jnp.float32, -k_hh, k_hh),
    }


def prepare_params(params):
    """Kernel-ready params: weights pre-transposed to bf16 MXU layout and the two
    gate biases fused — done once at prep time, not per forward call."""
    return {
        "embedding": params["embedding"].astype(jnp.bfloat16),              # (V, E)
        "w_ih_t": jnp.transpose(params["w_ih"]).astype(jnp.bfloat16),       # (E, 4H)
        "w_hh_t": jnp.transpose(params["w_hh"]).astype(jnp.bfloat16),       # (H, 4H)
        "w_fc_t": jnp.transpose(params["w_fc"]).astype(jnp.bfloat16),       # (H, V)
        "b_gates": (params["b_ih"] + params["b_hh"]).astype(jnp.float32),   # (4H,)
        "b_fc": params["b_fc"].astype(jnp.float32),                         # (V,)
    }


def text_generation_rl_model_forward(kparams, x):
    """x: (seq_len, batch) int32 token ids -> logits (seq_len, batch, vocab) f32."""
    S, B = x.shape
    V, E = kparams["embedding"].shape
    H4 = kparams["w_ih_t"].shape[1]
    H = H4 // 4

    # 1) Input-to-hidden projection for the whole sequence.
    if V < S * B:
        # Gate-table trick: vocab smaller than the token stream, so precompute
        # emb@W_ih^T + b for every vocab entry once and gather per token.
        gate_table = matmul_bias(kparams["embedding"], kparams["w_ih_t"],
                                 kparams["b_gates"], out_dtype=jnp.bfloat16)   # (V, 4H)
        gate_in = jnp.take(gate_table, x.reshape(-1), axis=0)                  # (S*B, 4H)
    else:
        embedded = jnp.take(kparams["embedding"], x.reshape(-1), axis=0)       # (S*B, E)
        gate_in = matmul_bias(embedded, kparams["w_ih_t"], kparams["b_gates"],
                              out_dtype=jnp.bfloat16)                          # (S*B, 4H)
    gate_in = gate_in.reshape(S, B, H4)

    # 2) Sequential LSTM recurrence (only h @ W_hh^T + elementwise per step).
    h_seq = lstm_recurrence(gate_in, kparams["w_hh_t"])                        # (S, B, H) bf16

    # 3) Vocab projection, hoisted out of the recurrence as one lane-dense matmul.
    logits = matmul_bias(h_seq.reshape(S * B, H), kparams["w_fc_t"],
                         kparams["b_fc"], out_dtype=jnp.float32)               # (S*B, V)

    # TODO(synk): reward_function (Python len() of generated text) has no tensor
    # equivalent and is intentionally not implemented as a kernel.
    return logits.reshape(S, B, V)


# Pure-JAX f32 reference (for correctness check).
def reference_forward(params, x):
    emb = jnp.take(params["embedding"], x, axis=0)
    H = params["w_hh"].shape[1]
    B = x.shape[1]

    def step(carry, x_t):
        h, c = carry
        gates = (x_t @ params["w_ih"].T + params["b_ih"]
                 + h @ params["w_hh"].T + params["b_hh"])
        i_g = jax.nn.sigmoid(gates[:, 0 * H:1 * H])
        f_g = jax.nn.sigmoid(gates[:, 1 * H:2 * H])
        g_g = jnp.tanh(gates[:, 2 * H:3 * H])
        o_g = jax.nn.sigmoid(gates[:, 3 * H:4 * H])
        c_new = f_g * c + i_g * g_g
        h_new = o_g * jnp.tanh(c_new)
        return (h_new, c_new), h_new

    h0 = jnp.zeros((B, H), jnp.float32)
    c0 = jnp.zeros((B, H), jnp.float32)
    _, hs = lax.scan(step, (h0, c0), emb)
    return hs @ params["w_fc"].T + params["b_fc"]


if __name__ == "__main__":
    # Small, lane/sublane-aligned shapes: B multiple of 8, E/H/V multiples of 128.
    vocab_size, embedding_dim, hidden_size = 256, 128, 128
    seq_len, batch = 16, 8

    key = jax.random.PRNGKey(0)
    k_params, k_tokens = jax.random.split(key)
    params = init_params(k_params, vocab_size, embedding_dim, hidden_size)
    # Round parameters to bf16 precision once so the f32 reference and the bf16
    # kernel path share identical weight values (isolates activation precision).
    params = jax.tree_util.tree_map(
        lambda p: p.astype(jnp.bfloat16).astype(jnp.float32), params)
    kparams = prepare_params(params)

    x = jax.random.randint(k_tokens, (seq_len, batch), 0, vocab_size, dtype=jnp.int32)

    logits = text_generation_rl_model_forward(kparams, x)
    logits = jax.block_until_ready(logits)

    ref = jax.block_until_ready(reference_forward(params, x))
    assert logits.shape == (seq_len, batch, vocab_size)
    # bf16 intermediates / MXU operands vs f32 reference -> loosened tolerance.
    np.testing.assert_allclose(np.asarray(logits), np.asarray(ref), rtol=5e-2, atol=5e-2)

    print("KERNEL_OK")
</pallas_src>

<mosaic_0001>
module attributes {stable_mosaic.version = 11 : i64} {
  func.func @matmul_bias_kernel(%arg0: i32, %arg1: i32, %arg2: i32, %arg3: memref<128x128xbf16, #tpu.memory_space<vmem>>, %arg4: memref<128x512xbf16, #tpu.memory_space<vmem>>, %arg5: memref<1x512xf32, #tpu.memory_space<vmem>>, %arg6: memref<128x512xbf16, #tpu.memory_space<vmem>>, %arg7: memref<128x512xf32, #tpu.memory_space<vmem>>) attributes {dimension_semantics = [#tpu.dimension_semantics<parallel>, #tpu.dimension_semantics<parallel>, #tpu.dimension_semantics<arbitrary>], iteration_bounds = array<i64: 1, 1, 1>, scalar_prefetch = 0 : i64, scratch_operands = 1 : i64, tpu.core_type = #tpu.core_type<tc>, window_params = [{transform_indices = @transform_0, window_bounds = array<i64: 128, 128>}, {transform_indices = @transform_1, window_bounds = array<i64: 128, 512>}, {transform_indices = @transform_2, window_bounds = array<i64: 1, 512>}, {transform_indices = @transform_3, window_bounds = array<i64: 128, 512>}]} {
    %c0_i32 = arith.constant 0 : i32
    %0 = arith.cmpi eq, %arg2, %c0_i32 : i32
    %1 = arith.extui %0 : i1 to i32
    %c0_i32_0 = arith.constant 0 : i32
    %2 = arith.cmpi ne, %1, %c0_i32_0 : i32
    scf.if %2 {
      %cst_10 = arith.constant 0.000000e+00 : f32
      %12 = vector.broadcast %cst_10 : f32 to vector<128x512xf32>
      %c0_11 = arith.constant 0 : index
      %c0_12 = arith.constant 0 : index
      %13 = vector.load %arg7[%c0_11, %c0_12] : memref<128x512xf32, #tpu.memory_space<vmem>>, vector<128x512xf32>
      tpu.vector_store %arg7[%c0_11, %c0_12], %12 {strides = array<i32>} : memref<128x512xf32, #tpu.memory_space<vmem>>, vector<128x512xf32>,
    } else {
    }
    %c0 = arith.constant 0 : index
    %c0_1 = arith.constant 0 : index
    %3 = vector.load %arg7[%c0, %c0_1] : memref<128x512xf32, #tpu.memory_space<vmem>>, vector<128x512xf32>
    %c0_2 = arith.constant 0 : index
    %c0_3 = arith.constant 0 : index
    %4 = vector.load %arg3[%c0_2, %c0_3] : memref<128x128xbf16, #tpu.memory_space<vmem>>, vector<128x128xbf16>
    %c0_4 = arith.constant 0 : index
    %c0_5 = arith.constant 0 : index
    %5 = vector.load %arg4[%c0_4, %c0_5] : memref<128x512xbf16, #tpu.memory_space<vmem>>, vector<128x512xbf16>
    %cst = arith.constant dense<0.000000e+00> : vector<128x512xf32>
    %6 = tpu.matmul %4, %5, %cst {dimension_numbers = #tpu.dot_dimension_numbers<[1], [0], [0], [1], [0, 0, 1, 1], [], []>} : vector<128x128xbf16>, vector<128x512xbf16>, vector<128x512xf32> -> vector<128x512xf32>
    %7 = arith.addf %3, %6 : vector<128x512xf32>
    %c0_6 = arith.constant 0 : index
    %c0_7 = arith.constant 0 : index
    %8 = vector.load %arg7[%c0_6, %c0_7] : memref<128x512xf32, #tpu.memory_space<vmem>>, vector<128x512xf32>
    tpu.vector_store %arg7[%c0_6, %c0_7], %7 {strides = array<i32>} : memref<128x512xf32, #tpu.memory_space<vmem>>, vector<128x512xf32>,
    %c0_i32_8 = arith.constant 0 : i32
    %9 = arith.cmpi eq, %arg2, %c0_i32_8 : i32
    %10 = arith.extui %9 : i1 to i32
    %c0_i32_9 = arith.constant 0 : i32
    %11 = arith.cmpi ne, %10, %c0_i32_9 : i32
    scf.if %11 {
      %c0_10 = arith.constant 0 : index
      %c0_11 = arith.constant 0 : index
      %12 = vector.load %arg7[%c0_10, %c0_11] : memref<128x512xf32, #tpu.memory_space<vmem>>, vector<128x512xf32>
      %c0_12 = arith.constant 0 : index
      %c0_13 = arith.constant 0 : index
      %13 = vector.load %arg5[%c0_12, %c0_13] : memref<1x512xf32, #tpu.memory_space<vmem>>, vector<1x512xf32>
      %14 = vector.broadcast %13 : vector<1x512xf32> to vector<128x512xf32>
      %15 = arith.addf %12, %14 : vector<128x512xf32>
      %16 = arith.truncf %15 : vector<128x512xf32> to vector<128x512xbf16>
      %c0_14 = arith.constant 0 : index
      %c0_15 = arith.constant 0 : index
      %17 = vector.load %arg6[%c0_14, %c0_15] : memref<128x512xbf16, #tpu.memory_space<vmem>>, vector<128x512xbf16>
      tpu.vector_store %arg6[%c0_14, %c0_15], %16 {strides = array<i32>} : memref<128x512xbf16, #tpu.memory_space<vmem>>, vector<128x512xbf16>,
    } else {
    }
    return
  }
  func.func @transform_0(%arg0: i32, %arg1: i32, %arg2: i32) -> (i32, i32) {
    %c0_i32 = arith.constant 0 : i32
    return %arg0, %arg2 : i32, i32
  }
  func.func @transform_1(%arg0: i32, %arg1: i32, %arg2: i32) -> (i32, i32) {
    %c0_i32 = arith.constant 0 : i32
    return %arg2, %arg1 : i32, i32
  }
  func.func @transform_2(%arg0: i32, %arg1: i32, %arg2: i32) -> (i32, i32) {
    %c0_i32 = arith.constant 0 : i32
    %c0_i32_0 = arith.constant 0 : i32
    return %c0_i32, %arg1 : i32, i32
  }
  func.func @transform_3(%arg0: i32, %arg1: i32, %arg2: i32) -> (i32, i32) {
    %c0_i32 = arith.constant 0 : i32
    return %arg0, %arg1 : i32, i32
  }
}

</mosaic_0001>

<bundles_post_ra>
// kernel: tpu_custom_call.1
= control target key start
LH: loop header
LB: loop body
LE: loop exit
PB: predicated region body
PF: predicated region fallthrough
CT: control target
= control target key end

     0   :  { %8 = vsyncpa [#allocation4], 0  ;;  %s1425_s0 = inlined_call_operand.hbm [shape: bf16[128,128], index: 0, kind: input, shape index: {}]   ;;  %s1426_s1 = inlined_call_operand.hbm [shape: bf16[128,512], index: 1, kind: input, shape index: {}]   ;;  %s1427_s2 = inlined_call_operand.hbm [shape: f32[1,512], index: 2, kind: input, shape index: {}]   ;;  %s1428_s3 = inlined_call_operand.hbm [shape: bf16[128,512], index: 3, kind: output, shape index: {}]  }
   0x1   :  { %9 = vsyncpa [#allocation7], 0  ;;  %s28_s14 = sshll.u32 %s1426_s1, 4  ;;  %s29_s14 = int_to_ptr.hbm [resolvable:$true] %s28_s14 }
   0x2   :  { %10 = vsyncpa [#allocation5], 0  ;;  %s1307_s15 = smov [#allocation6]   ;;  %s15_s19 = sshll.u32 %s1425_s0, 4  ;;  %s16_s19 = int_to_ptr.hbm [resolvable:$true] %s15_s19 }
   0x3   :  { %s30_s16 = sshll.u32 %s1307_s15, 4  ;;  %s1308_s20 = smov 256   ;;  %s31_s16 = int_to_ptr.vmem [resolvable:$true] %s30_s16 }
   0x4   :  { %s1309_s21 = smov 16   ;;  %s1310_s22 = smov [#allocation3]  }
   0x5   :  { %36 = dma.hbm_to_vmem [thread:$0]  %s29_s14, 4096, %s31_s16, [#allocation7], %s1308_s20, %s1308_s20, %s1309_s21  }
   0x6   :  { %s17_s23 = sshll.u32 %s1310_s22, 4  ;;  %s1311_s1 = smov 64   ;;  %s18_s23 = int_to_ptr.vmem [resolvable:$true] %s17_s23 }
   0x7   :  { %s1312_s24 = smov 4   ;;  %s42_s27 = sshll.u32 %s1427_s2, 4  ;;  %s43_s27 = int_to_ptr.hbm [resolvable:$true] %s42_s27 }
   0x8   :  { %23 = dma.hbm_to_vmem [thread:$0]  %s16_s19, 1024, %s18_s23, [#allocation4], %s1311_s1, %s1311_s1, %s1312_s24  }
   0x9   :  { %s1313_s28 = smov [#allocation8]  }
   0xa   :  { %s44_s0 = sshll.u32 %s1313_s28, 4  ;;  %s45_s0 = int_to_ptr.vmem [resolvable:$true] %s44_s0 }
   0xb   :  { %47 = dma.hbm_to_vmem [thread:$0]  %s43_s27, 64, %s45_s0, [#allocation7]  }
   0xc   :  { %1301 = dma.done.wait [#allocation4], 1024  }
   0xd   :  { %1302 = vsyncadd [#allocation4], 4294966272 }
   0xe   :  { %1303 = dma.done.wait [#allocation7], 4160  }
   0xf   :  { %1304 = vsyncadd [#allocation7], 4294963136  ;;  %v1143_v0 = vld [vmem:[#allocation6 + $0xe0] sm:$0xf]  ;;  %v1195_v1 = vld [vmem:[#allocation6 + $0xec] sm:$0xf0] }
  0x10   :  { %v1193_v2 = vld [vmem:[#allocation6 + $0xe4] sm:$0xf]  ;;  %v1144_v3 = vor.u32 %v1195_v1, %v1143_v0  ;;  %v1145_v4 = vld [vmem:[#allocation6 + $0xf0] sm:$0xf0]  ;;  %v1151_v5 = vld [vmem:[#allocation6 + $0xe8] sm:$0xf] }
  0x11   :  { %v1196_v6 = vld [vmem:[#allocation6 + $0xf4] sm:$0xf0]  ;;  %v1148_v7 = vor.u32 %v1193_v2, %v1145_v4  ;;  %v1194_v9 = vld [vmem:[#allocation6 + $0xec] sm:$0xf]  ;;  %v1153_v10 = vld [vmem:[#allocation6 + $0xf8] sm:$0xf0] }
  0x12   :  { %v1152_v8 = vor.u32 %v1196_v6, %v1151_v5  ;;  %v1127_v11 = vld [vmem:[#allocation6 + $0xc0] sm:$0xf]  ;;  %448 = vmatpush.bf16.msra.mxu0 %v1144_v3  ;;  %v1156_v12 = vor.u32 %v1194_v9, %v1153_v10  ;;  %v1191_v13 = vld [vmem:[#allocation6 + $0xcc] sm:$0xf0]  ;;  %v1189_v14 = vld [vmem:[#allocation6 + $0xc4] sm:$0xf] }
  0x13   :  { %v1129_v15 = vld [vmem:[#allocation6 + $0xd0] sm:$0xf0]  ;;  %497 = vmatpush.bf16.msra.mxu1 %v1148_v7  ;;  %v1128_v16 = vor.u32 %v1191_v13, %v1127_v11  ;;  %v1135_v18 = vld [vmem:[#allocation6 + $0xc8] sm:$0xf]  ;;  %v1192_v19 = vld [vmem:[#allocation6 + $0xd4] sm:$0xf0] }
  0x14   :  { %546 = vmatpush.bf16.msra.mxu2 %v1152_v8  ;;  %v1132_v17 = vor.u32 %v1189_v14, %v1129_v15  ;;  %v1190_v20 = vld [vmem:[#allocation6 + $0xcc] sm:$0xf]  ;;  %595 = vmatpush.bf16.msra.mxu3 %v1156_v12  ;;  %v1136_v21 = vor.u32 %v1192_v19, %v1135_v18  ;;  %v1137_v22 = vld [vmem:[#allocation6 + $0xd8] sm:$0xf0]  ;;  %v1111_v23 = vld [vmem:[#allocation6 + $0xa0] sm:$0xf] }
  0x15   :  { %v1187_v24 = vld [vmem:[#allocation6 + $0xac] sm:$0xf0]  ;;  %v1140_v25 = vor.u32 %v1190_v20, %v1137_v22  ;;  %v1185_v26 = vld [vmem:[#allocation6 + $0xa4] sm:$0xf]  ;;  %v1113_v27 = vld [vmem:[#allocation6 + $0xb0] sm:$0xf0] }
  0x16   :  { %v1119_v28 = vld [vmem:[#allocation6 + $0xa8] sm:$0xf]  ;;  %449 = vmatpush.bf16.msra.mxu0 %v1128_v16  ;;  %v1112_v29 = vor.u32 %v1187_v24, %v1111_v23  ;;  %v1188_v30 = vld [vmem:[#allocation6 + $0xb4] sm:$0xf0]  ;;  %v1186_v31 = vld [vmem:[#allocation6 + $0xac] sm:$0xf]  ;;  %v1116_v33 = vor.u32 %v1185_v26, %v1113_v27 }
  0x17   :  { %v1121_v32 = vld [vmem:[#allocation6 + $0xb8] sm:$0xf0]  ;;  %498 = vmatpush.bf16.msra.mxu1 %v1132_v17  ;;  %v1120_v34 = vor.u32 %v1188_v30, %v1119_v28  ;;  %v1095_v35 = vld [vmem:[#allocation6 + $0x80] sm:$0xf]  ;;  %v1183_v36 = vld [vmem:[#allocation6 + $0x8c] sm:$0xf0] }
  0x18   :  { %547 = vmatpush.bf16.msra.mxu2 %v1136_v21  ;;  %v1181_v37 = vld [vmem:[#allocation6 + $0x84] sm:$0xf]  ;;  %596 = vmatpush.bf16.msra.mxu3 %v1140_v25  ;;  %v1124_v38 = vor.u32 %v1186_v31, %v1121_v32  ;;  %v1097_v39 = vld [vmem:[#allocation6 + $0x90] sm:$0xf0]  ;;  %v1103_v40 = vld [vmem:[#allocation6 + $0x88] sm:$0xf]  ;;  %v1096_v44 = vor.u32 %v1183_v36, %v1095_v35 }
  0x19   :  { %v1184_v41 = vld [vmem:[#allocation6 + $0x94] sm:$0xf0]  ;;  %v1182_v42 = vld [vmem:[#allocation6 + $0x8c] sm:$0xf]  ;;  %v1105_v43 = vld [vmem:[#allocation6 + $0x98] sm:$0xf0]  ;;  %v1100_v45 = vor.u32 %v1181_v37, %v1097_v39 }
  0x1a   :  { %450 = vmatpush.bf16.msra.mxu0 %v1112_v29  ;;  %v1104_v46 = vor.u32 %v1184_v41, %v1103_v40  ;;  %v1079_v47 = vld [vmem:[#allocation6 + $0x60] sm:$0xf]  ;;  %v1179_v48 = vld [vmem:[#allocation6 + $0x6c] sm:$0xf0]  ;;  %v1177_v49 = vld [vmem:[#allocation6 + $0x64] sm:$0xf]  ;;  %v1108_v50 = vor.u32 %v1182_v42, %v1105_v43 }
  0x1b   :  { %499 = vmatpush.bf16.msra.mxu1 %v1116_v33  ;;  %v1081_v51 = vld [vmem:[#allocation6 + $0x70] sm:$0xf0]  ;;  %v1087_v52 = vld [vmem:[#allocation6 + $0x68] sm:$0xf]  ;;  %v1180_v53 = vld [vmem:[#allocation6 + $0x74] sm:$0xf0]  ;;  %v1080_v56 = vor.u32 %v1179_v48, %v1079_v47 }
  0x1c   :  { %548 = vmatpush.bf16.msra.mxu2 %v1120_v34  ;;  %597 = vmatpush.bf16.msra.mxu3 %v1124_v38  ;;  %v1178_v54 = vld [vmem:[#allocation6 + $0x6c] sm:$0xf]  ;;  %v1089_v55 = vld [vmem:[#allocation6 + $0x78] sm:$0xf0]  ;;  %v1084_v57 = vor.u32 %v1177_v49, %v1081_v51  ;;  %v1088_v58 = vor.u32 %v1180_v53, %v1087_v52  ;;  %v1063_v59 = vld [vmem:[#allocation6 + $0x40] sm:$0xf] }
  0x1d   :  { %v1175_v60 = vld [vmem:[#allocation6 + $0x4c] sm:$0xf0]  ;;  %v1173_v61 = vld [vmem:[#allocation6 + $0x44] sm:$0xf]  ;;  %v1092_v62 = vor.u32 %v1178_v54, %v1089_v55  ;;  %v1065_v63 = vld [vmem:[#allocation6 + $0x50] sm:$0xf0] }
  0x1e   :  { %451 = vmatpush.bf16.msra.mxu0 %v1096_v44  ;;  %v1071_v0 = vld [vmem:[#allocation6 + $0x48] sm:$0xf]  ;;  %v1176_v1 = vld [vmem:[#allocation6 + $0x54] sm:$0xf0]  ;;  %v1174_v2 = vld [vmem:[#allocation6 + $0x4c] sm:$0xf]  ;;  %v1064_v4 = vor.u32 %v1175_v60, %v1063_v59  ;;  %v1068_v5 = vor.u32 %v1173_v61, %v1065_v63 }
  0x1f   :  { %500 = vmatpush.bf16.msra.mxu1 %v1100_v45  ;;  %v1073_v3 = vld [vmem:[#allocation6 + $0x58] sm:$0xf0]  ;;  %v1072_v6 = vor.u32 %v1176_v1, %v1071_v0  ;;  %v1047_v7 = vld [vmem:[#allocation6 + $0x20] sm:$0xf]  ;;  %v1171_v8 = vld [vmem:[#allocation6 + $0x2c] sm:$0xf0] }
  0x20   :  { %549 = vmatpush.bf16.msra.mxu2 %v1104_v46  ;;  %598 = vmatpush.bf16.msra.mxu3 %v1108_v50  ;;  %v1169_v9 = vld [vmem:[#allocation6 + $0x24] sm:$0xf]  ;;  %v1076_v10 = vor.u32 %v1174_v2, %v1073_v3  ;;  %v1049_v11 = vld [vmem:[#allocation6 + $0x30] sm:$0xf0]  ;;  %v1055_v12 = vld [vmem:[#allocation6 + $0x28] sm:$0xf]  ;;  %v1048_v16 = vor.u32 %v1171_v8, %v1047_v7 }
  0x21   :  { %v1172_v13 = vld [vmem:[#allocation6 + $0x34] sm:$0xf0]  ;;  %v1170_v14 = vld [vmem:[#allocation6 + $0x2c] sm:$0xf]  ;;  %v1057_v15 = vld [vmem:[#allocation6 + $0x38] sm:$0xf0]  ;;  %v1052_v17 = vor.u32 %v1169_v9, %v1049_v11 }
  0x22   :  { %452 = vmatpush.bf16.msra.mxu0 %v1080_v56  ;;  %v1056_v18 = vor.u32 %v1172_v13, %v1055_v12  ;;  %v1031_v19 = vld [vmem:[#allocation6] sm:$0xf]  ;;  %v1167_v20 = vld [vmem:[#allocation6 + $0xc] sm:$0xf0]  ;;  %v1165_v21 = vld [vmem:[#allocation6 + $0x4] sm:$0xf]  ;;  %v1060_v22 = vor.u32 %v1170_v14, %v1057_v15 }
  0x23   :  { %501 = vmatpush.bf16.msra.mxu1 %v1084_v57  ;;  %v1033_v23 = vld [vmem:[#allocation6 + $0x10] sm:$0xf0]  ;;  %v1039_v24 = vld [vmem:[#allocation6 + $0x8] sm:$0xf]  ;;  %v1168_v25 = vld [vmem:[#allocation6 + $0x14] sm:$0xf0]  ;;  %v1032_v28 = vor.u32 %v1167_v20, %v1031_v19 }
  0x24   :  { %550 = vmatpush.bf16.msra.mxu2 %v1088_v58  ;;  %599 = vmatpush.bf16.msra.mxu3 %v1092_v62  ;;  %v1166_v26 = vld [vmem:[#allocation6 + $0xc] sm:$0xf]  ;;  %v1041_v27 = vld [vmem:[#allocation6 + $0x18] sm:$0xf0]  ;;  %v1036_v29 = vor.u32 %v1165_v21, %v1033_v23  ;;  %v1040_v30 = vor.u32 %v1168_v25, %v1039_v24  ;;  %v1157_v32 = vld [vmem:[#allocation3] sm:$0xff]  ;;  %s1314_s2 = smov [#allocation9]  }
  0x25   :  { %v1044_v31 = vor.u32 %v1166_v26, %v1041_v27  ;;  %v1158_v33 = vld [vmem:[#allocation3 + $0x8] sm:$0xff]  ;;  %v1159_v34 = vld [vmem:[#allocation3 + $0x10] sm:$0xff]  ;;  %v1160_v35 = vld [vmem:[#allocation3 + $0x18] sm:$0xff]  ;;  %s981_s29 = sshll.u32 %s1314_s2, 4  ;;  %s983_s5 = sshll.u32 %s1428_s3, 4  ;;  %s982_s29 = int_to_ptr.vmem [resolvable:$true] %s981_s29  ;;  %s984_s5 = int_to_ptr.hbm [resolvable:$true] %s983_s5 }
  0x26   :  { %453 = vmatpush.bf16.msra.mxu0 %v1064_v4  ;;  %v1161_v36 = vld [vmem:[#allocation3 + $0x20] sm:$0xff]  ;;  %v1162_v37 = vld [vmem:[#allocation3 + $0x28] sm:$0xff]  ;;  %v1163_v38 = vld [vmem:[#allocation3 + $0x30] sm:$0xff] }
  0x27   :  { %502 = vmatpush.bf16.msra.mxu1 %v1068_v5  ;;  %v1164_v39 = vld [vmem:[#allocation3 + $0x38] sm:$0xff]  ;;  %v839_v40 = vld [vmem:[#allocation8] sm:$0xf] }
  0x28   :  { %551 = vmatpush.bf16.msra.mxu2 %v1072_v6  ;;  %600 = vmatpush.bf16.msra.mxu3 %v1076_v10  ;;  %v1347_v41 = vperm.slane %v839_v40, 0  ;;  %v1349_v42 = vperm.slane %v839_v40, 1  ;;  %v1353_v48 = vperm.slane %v839_v40, 2  ;;  %v1355_v49 = vperm.slane %v839_v40, 3 }
  0x2a   :  { %454 = vmatpush.bf16.msra.mxu0 %v1048_v16 }
  0x2b   :  { %503 = vmatpush.bf16.msra.mxu1 %v1052_v17 }
  0x2c   :  { %552 = vmatpush.bf16.msra.mxu2 %v1056_v18  ;;  %601 = vmatpush.bf16.msra.mxu3 %v1060_v22 }
  0x2e   :  { %455 = vmatpush.bf16.msra.mxu0 %v1032_v28 }
  0x2f   :  { %504 = vmatpush.bf16.msra.mxu1 %v1036_v29 }
  0x30   :  { %553 = vmatpush.bf16.msra.mxu2 %v1040_v30  ;;  %602 = vmatpush.bf16.msra.mxu3 %v1044_v31 }
  0x31   :  { %456 = vmatmul.bf16.vlgmr.msra.gmra.mxu0 %v1157_v32 }
  0x32   :  { %505 = vmatmul.bf16.vlgmr.msra.gmra.mxu1 %v1157_v32 }
  0x33   :  { %554 = vmatmul.bf16.vlgmr.msra.gmra.mxu2 %v1157_v32  ;;  %603 = vmatmul.bf16.vlgmr.msra.gmra.mxu3 %v1157_v32 }
  0x41   :  { %461 = vmatmul.bf16.gmra.mxu0 %v1158_v33 }
  0x42   :  { %510 = vmatmul.bf16.gmra.mxu1 %v1158_v33 }
  0x43   :  { %559 = vmatmul.bf16.gmra.mxu2 %v1158_v33  ;;  %608 = vmatmul.bf16.gmra.mxu3 %v1158_v33 }
  0x51   :  { %466 = vmatmul.bf16.gmra.mxu0 %v1159_v34 }
  0x52   :  { %515 = vmatmul.bf16.gmra.mxu1 %v1159_v34 }
  0x53   :  { %564 = vmatmul.bf16.gmra.mxu2 %v1159_v34  ;;  %613 = vmatmul.bf16.gmra.mxu3 %v1159_v34 }
  0x61   :  { %471 = vmatmul.bf16.gmra.mxu0 %v1160_v35 }
  0x62   :  { %520 = vmatmul.bf16.gmra.mxu1 %v1160_v35 }
  0x63   :  { %569 = vmatmul.bf16.gmra.mxu2 %v1160_v35  ;;  %618 = vmatmul.bf16.gmra.mxu3 %v1160_v35 }
  0x71   :  { %476 = vmatmul.bf16.gmra.mxu0 %v1161_v36 }
  0x72   :  { %525 = vmatmul.bf16.gmra.mxu1 %v1161_v36 }
  0x73   :  { %574 = vmatmul.bf16.gmra.mxu2 %v1161_v36  ;;  %623 = vmatmul.bf16.gmra.mxu3 %v1161_v36 }
  0x81   :  { %481 = vmatmul.bf16.gmra.mxu0 %v1162_v37 }
  0x82   :  { %530 = vmatmul.bf16.gmra.mxu1 %v1162_v37 }
  0x83   :  { %579 = vmatmul.bf16.gmra.mxu2 %v1162_v37  ;;  %628 = vmatmul.bf16.gmra.mxu3 %v1162_v37 }
  0x91   :  { %486 = vmatmul.bf16.gmra.mxu0 %v1163_v38 }
  0x92   :  { %535 = vmatmul.bf16.gmra.mxu1 %v1163_v38 }
  0x93   :  { %584 = vmatmul.bf16.gmra.mxu2 %v1163_v38  ;;  %633 = vmatmul.bf16.gmra.mxu3 %v1163_v38 }
  0xa1   :  { %491 = vmatmul.bf16.gmra.mxu0 %v1164_v39 }
  0xa2   :  { %540 = vmatmul.bf16.gmra.mxu1 %v1164_v39 }
  0xa3   :  { %589 = vmatmul.bf16.gmra.mxu2 %v1164_v39  ;;  %638 = vmatmul.bf16.gmra.mxu3 %v1164_v39 }
  0xae   :  { %v457_v43 = vpop.f32.mrf.mxu0 }
  0xaf   :  { %v849_v44 = vadd.f32 %v1347_v41, %v457_v43  ;;  %v506_v45 = vpop.f32.mrf.mxu1 }
  0xb0   :  { %v850_v46 = vadd.f32 %v1349_v42, %v506_v45 }
  0xb2   :  { %v913_v47 = vpack.c.bf16 %v850_v46, %v849_v44 }
  0xb4   :  { %945 = vst [vmem:[#allocation9] sm:$0xff] %v913_v47 }
  0xb6   :  { %v555_v50 = vpop.f32.mrf.mxu2  ;;  %v604_v52 = vpop.f32.mrf.mxu3 }
  0xb7   :  { %v851_v51 = vadd.f32 %v1353_v48, %v555_v50  ;;  %v459_v53 = vpop.f32.mrf.mxu0  ;;  %v852_v54 = vadd.f32 %v1355_v49, %v604_v52  ;;  %v508_v56 = vpop.f32.mrf.mxu1 }
  0xb8   :  { %v853_v55 = vadd.f32 %v1347_v41, %v459_v53  ;;  %v854_v57 = vadd.f32 %v1349_v42, %v508_v56 }
  0xb9   :  { %v914_v58 = vpack.c.bf16 %v852_v54, %v851_v51 }
  0xba   :  { %v915_v59 = vpack.c.bf16 %v854_v57, %v853_v55 }
  0xbb   :  { %946 = vst [vmem:[#allocation9 + $0x8] sm:$0xff] %v914_v58 }
  0xbc   :  { %947 = vst [vmem:[#allocation9 + $0x10] sm:$0xff] %v915_v59 }
  0xbe   :  { %v557_v60 = vpop.f32.mrf.mxu2  ;;  %v606_v62 = vpop.f32.mrf.mxu3 }
  0xbf   :  { %v855_v61 = vadd.f32 %v1353_v48, %v557_v60  ;;  %v462_v63 = vpop.f32.mrf.mxu0  ;;  %v856_v0 = vadd.f32 %v1355_v49, %v606_v62  ;;  %v511_v2 = vpop.f32.mrf.mxu1 }
  0xc0   :  { %v857_v1 = vadd.f32 %v1347_v41, %v462_v63  ;;  %v858_v3 = vadd.f32 %v1349_v42, %v511_v2 }
  0xc1   :  { %v916_v4 = vpack.c.bf16 %v856_v0, %v855_v61 }
  0xc2   :  { %v917_v5 = vpack.c.bf16 %v858_v3, %v857_v1 }
  0xc3   :  { %948 = vst [vmem:[#allocation9 + $0x18] sm:$0xff] %v916_v4 }
  0xc4   :  { %949 = vst [vmem:[#allocation9 + $0x20] sm:$0xff] %v917_v5 }
  0xc6   :  { %v560_v6 = vpop.f32.mrf.mxu2  ;;  %v609_v8 = vpop.f32.mrf.mxu3 }
  0xc7   :  { %v859_v7 = vadd.f32 %v1353_v48, %v560_v6  ;;  %v464_v9 = vpop.f32.mrf.mxu0  ;;  %v860_v10 = vadd.f32 %v1355_v49, %v609_v8  ;;  %v513_v12 = vpop.f32.mrf.mxu1 }
  0xc8   :  { %v861_v11 = vadd.f32 %v1347_v41, %v464_v9  ;;  %v862_v13 = vadd.f32 %v1349_v42, %v513_v12 }
  0xc9   :  { %v918_v14 = vpack.c.bf16 %v860_v10, %v859_v7 }
  0xca   :  { %v919_v15 = vpack.c.bf16 %v862_v13, %v861_v11 }
  0xcb   :  { %950 = vst [vmem:[#allocation9 + $0x28] sm:$0xff] %v918_v14 }
  0xcc   :  { %951 = vst [vmem:[#allocation9 + $0x30] sm:$0xff] %v919_v15 }
  0xce   :  { %v562_v16 = vpop.f32.mrf.mxu2  ;;  %v611_v18 = vpop.f32.mrf.mxu3 }
  0xcf   :  { %v863_v17 = vadd.f32 %v1353_v48, %v562_v16  ;;  %v467_v19 = vpop.f32.mrf.mxu0  ;;  %v864_v20 = vadd.f32 %v1355_v49, %v611_v18  ;;  %v516_v22 = vpop.f32.mrf.mxu1 }
  0xd0   :  { %v865_v21 = vadd.f32 %v1347_v41, %v467_v19  ;;  %v866_v23 = vadd.f32 %v1349_v42, %v516_v22 }
  0xd1   :  { %v920_v24 = vpack.c.bf16 %v864_v20, %v863_v17 }
  0xd2   :  { %v921_v25 = vpack.c.bf16 %v866_v23, %v865_v21 }
  0xd3   :  { %952 = vst [vmem:[#allocation9 + $0x38] sm:$0xff] %v920_v24 }
  0xd4   :  { %953 = vst [vmem:[#allocation9 + $0x40] sm:$0xff] %v921_v25 }
  0xd6   :  { %v565_v26 = vpop.f32.mrf.mxu2  ;;  %v614_v28 = vpop.f32.mrf.mxu3 }
  0xd7   :  { %v867_v27 = vadd.f32 %v1353_v48, %v565_v26  ;;  %v469_v29 = vpop.f32.mrf.mxu0  ;;  %v868_v30 = vadd.f32 %v1355_v49, %v614_v28  ;;  %v518_v32 = vpop.f32.mrf.mxu1 }
  0xd8   :  { %v869_v31 = vadd.f32 %v1347_v41, %v469_v29  ;;  %v870_v33 = vadd.f32 %v1349_v42, %v518_v32 }
  0xd9   :  { %v922_v34 = vpack.c.bf16 %v868_v30, %v867_v27 }
  0xda   :  { %v923_v35 = vpack.c.bf16 %v870_v33, %v869_v31 }
  0xdb   :  { %954 = vst [vmem:[#allocation9 + $0x48] sm:$0xff] %v922_v34 }
  0xdc   :  { %955 = vst [vmem:[#allocation9 + $0x50] sm:$0xff] %v923_v35 }
  0xde   :  { %v567_v36 = vpop.f32.mrf.mxu2  ;;  %v616_v38 = vpop.f32.mrf.mxu3 }
  0xdf   :  { %v871_v37 = vadd.f32 %v1353_v48, %v567_v36  ;;  %v472_v39 = vpop.f32.mrf.mxu0  ;;  %v872_v40 = vadd.f32 %v1355_v49, %v616_v38  ;;  %v521_v44 = vpop.f32.mrf.mxu1 }
  0xe0   :  { %v873_v43 = vadd.f32 %v1347_v41, %v472_v39  ;;  %v874_v45 = vadd.f32 %v1349_v42, %v521_v44 }
  0xe1   :  { %v924_v46 = vpack.c.bf16 %v872_v40, %v871_v37 }
  0xe2   :  { %v925_v47 = vpack.c.bf16 %v874_v45, %v873_v43 }
  0xe3   :  { %956 = vst [vmem:[#allocation9 + $0x58] sm:$0xff] %v924_v46 }
  0xe4   :  { %957 = vst [vmem:[#allocation9 + $0x60] sm:$0xff] %v925_v47 }
  0xe6   :  { %v570_v50 = vpop.f32.mrf.mxu2  ;;  %v619_v52 = vpop.f32.mrf.mxu3 }
  0xe7   :  { %v875_v51 = vadd.f32 %v1353_v48, %v570_v50  ;;  %v474_v53 = vpop.f32.mrf.mxu0  ;;  %v876_v54 = vadd.f32 %v1355_v49, %v619_v52  ;;  %v523_v56 = vpop.f32.mrf.mxu1 }
  0xe8   :  { %v877_v55 = vadd.f32 %v1347_v41, %v474_v53  ;;  %v878_v57 = vadd.f32 %v1349_v42, %v523_v56 }
  0xe9   :  { %v926_v58 = vpack.c.bf16 %v876_v54, %v875_v51 }
  0xea   :  { %v927_v59 = vpack.c.bf16 %v878_v57, %v877_v55 }
  0xeb   :  { %958 = vst [vmem:[#allocation9 + $0x68] sm:$0xff] %v926_v58 }
  0xec   :  { %959 = vst [vmem:[#allocation9 + $0x70] sm:$0xff] %v927_v59 }
  0xee   :  { %v572_v60 = vpop.f32.mrf.mxu2  ;;  %v621_v62 = vpop.f32.mrf.mxu3 }
  0xef   :  { %v879_v61 = vadd.f32 %v1353_v48, %v572_v60  ;;  %v477_v63 = vpop.f32.mrf.mxu0  ;;  %v880_v0 = vadd.f32 %v1355_v49, %v621_v62  ;;  %v526_v2 = vpop.f32.mrf.mxu1 }
  0xf0   :  { %v881_v1 = vadd.f32 %v1347_v41, %v477_v63  ;;  %v882_v3 = vadd.f32 %v1349_v42, %v526_v2 }
  0xf1   :  { %v928_v4 = vpack.c.bf16 %v880_v0, %v879_v61 }
  0xf2   :  { %v929_v5 = vpack.c.bf16 %v882_v3, %v881_v1 }
  0xf3   :  { %960 = vst [vmem:[#allocation9 + $0x78] sm:$0xff] %v928_v4 }
  0xf4   :  { %961 = vst [vmem:[#allocation9 + $0x80] sm:$0xff] %v929_v5 }
  0xf6   :  { %v575_v6 = vpop.f32.mrf.mxu2  ;;  %v624_v8 = vpop.f32.mrf.mxu3 }
  0xf7   :  { %v883_v7 = vadd.f32 %v1353_v48, %v575_v6  ;;  %v479_v9 = vpop.f32.mrf.mxu0  ;;  %v884_v10 = vadd.f32 %v1355_v49, %v624_v8  ;;  %v528_v12 = vpop.f32.mrf.mxu1 }
  0xf8   :  { %v885_v11 = vadd.f32 %v1347_v41, %v479_v9  ;;  %v886_v13 = vadd.f32 %v1349_v42, %v528_v12 }
  0xf9   :  { %v930_v14 = vpack.c.bf16 %v884_v10, %v883_v7 }
  0xfa   :  { %v931_v15 = vpack.c.bf16 %v886_v13, %v885_v11 }
  0xfb   :  { %962 = vst [vmem:[#allocation9 + $0x88] sm:$0xff] %v930_v14 }
  0xfc   :  { %963 = vst [vmem:[#allocation9 + $0x90] sm:$0xff] %v931_v15 }
  0xfe   :  { %v577_v16 = vpop.f32.mrf.mxu2  ;;  %v626_v18 = vpop.f32.mrf.mxu3 }
  0xff   :  { %v887_v17 = vadd.f32 %v1353_v48, %v577_v16  ;;  %v482_v19 = vpop.f32.mrf.mxu0  ;;  %v888_v20 = vadd.f32 %v1355_v49, %v626_v18  ;;  %v531_v22 = vpop.f32.mrf.mxu1 }
 0x100   :  { %v889_v21 = vadd.f32 %v1347_v41, %v482_v19  ;;  %v890_v23 = vadd.f32 %v1349_v42, %v531_v22 }
 0x101   :  { %v932_v24 = vpack.c.bf16 %v888_v20, %v887_v17 }
 0x102   :  { %v933_v25 = vpack.c.bf16 %v890_v23, %v889_v21 }
 0x103   :  { %964 = vst [vmem:[#allocation9 + $0x98] sm:$0xff] %v932_v24 }
 0x104   :  { %965 = vst [vmem:[#allocation9 + $0xa0] sm:$0xff] %v933_v25 }
 0x106   :  { %v580_v26 = vpop.f32.mrf.mxu2  ;;  %v629_v28 = vpop.f32.mrf.mxu3 }
 0x107   :  { %v891_v27 = vadd.f32 %v1353_v48, %v580_v26  ;;  %v484_v29 = vpop.f32.mrf.mxu0  ;;  %v892_v30 = vadd.f32 %v1355_v49, %v629_v28  ;;  %v533_v32 = vpop.f32.mrf.mxu1 }
 0x108   :  { %v893_v31 = vadd.f32 %v1347_v41, %v484_v29  ;;  %v894_v33 = vadd.f32 %v1349_v42, %v533_v32 }
 0x109   :  { %v934_v34 = vpack.c.bf16 %v892_v30, %v891_v27 }
 0x10a   :  { %v935_v35 = vpack.c.bf16 %v894_v33, %v893_v31 }
 0x10b   :  { %966 = vst [vmem:[#allocation9 + $0xa8] sm:$0xff] %v934_v34 }
 0x10c   :  { %967 = vst [vmem:[#allocation9 + $0xb0] sm:$0xff] %v935_v35 }
 0x10e   :  { %v582_v36 = vpop.f32.mrf.mxu2  ;;  %v631_v38 = vpop.f32.mrf.mxu3 }
 0x10f   :  { %v895_v37 = vadd.f32 %v1353_v48, %v582_v36  ;;  %v487_v39 = vpop.f32.mrf.mxu0  ;;  %v896_v40 = vadd.f32 %v1355_v49, %v631_v38  ;;  %v536_v44 = vpop.f32.mrf.mxu1 }
 0x110   :  { %v897_v43 = vadd.f32 %v1347_v41, %v487_v39  ;;  %v898_v45 = vadd.f32 %v1349_v42, %v536_v44 }
 0x111   :  { %v936_v46 = vpack.c.bf16 %v896_v40, %v895_v37 }
 0x112   :  { %v937_v47 = vpack.c.bf16 %v898_v45, %v897_v43 }
 0x113   :  { %968 = vst [vmem:[#allocation9 + $0xb8] sm:$0xff] %v936_v46 }
 0x114   :  { %969 = vst [vmem:[#allocation9 + $0xc0] sm:$0xff] %v937_v47 }
 0x116   :  { %v585_v50 = vpop.f32.mrf.mxu2  ;;  %v634_v52 = vpop.f32.mrf.mxu3 }
 0x117   :  { %v899_v51 = vadd.f32 %v1353_v48, %v585_v50  ;;  %v489_v53 = vpop.f32.mrf.mxu0  ;;  %v900_v54 = vadd.f32 %v1355_v49, %v634_v52  ;;  %v538_v56 = vpop.f32.mrf.mxu1 }
 0x118   :  { %v901_v55 = vadd.f32 %v1347_v41, %v489_v53  ;;  %v902_v57 = vadd.f32 %v1349_v42, %v538_v56 }
 0x119   :  { %v938_v58 = vpack.c.bf16 %v900_v54, %v899_v51 }
 0x11a   :  { %v939_v59 = vpack.c.bf16 %v902_v57, %v901_v55 }
 0x11b   :  { %970 = vst [vmem:[#allocation9 + $0xc8] sm:$0xff] %v938_v58 }
 0x11c   :  { %971 = vst [vmem:[#allocation9 + $0xd0] sm:$0xff] %v939_v59 }
 0x11e   :  { %v587_v60 = vpop.f32.mrf.mxu2  ;;  %v636_v62 = vpop.f32.mrf.mxu3 }
 0x11f   :  { %v903_v61 = vadd.f32 %v1353_v48, %v587_v60  ;;  %v492_v63 = vpop.f32.mrf.mxu0  ;;  %v904_v0 = vadd.f32 %v1355_v49, %v636_v62  ;;  %v541_v2 = vpop.f32.mrf.mxu1 }
 0x120   :  { %v905_v1 = vadd.f32 %v1347_v41, %v492_v63  ;;  %v906_v3 = vadd.f32 %v1349_v42, %v541_v2 }
 0x121   :  { %v940_v4 = vpack.c.bf16 %v904_v0, %v903_v61 }
 0x122   :  { %v941_v5 = vpack.c.bf16 %v906_v3, %v905_v1 }
 0x123   :  { %972 = vst [vmem:[#allocation9 + $0xd8] sm:$0xff] %v940_v4 }
 0x124   :  { %973 = vst [vmem:[#allocation9 + $0xe0] sm:$0xff] %v941_v5 }
 0x126   :  { %v590_v6 = vpop.f32.mrf.mxu2  ;;  %v639_v8 = vpop.f32.mrf.mxu3 }
 0x127   :  { %v907_v7 = vadd.f32 %v1353_v48, %v590_v6  ;;  %v494_v9 = vpop.f32.mrf.mxu0  ;;  %v908_v10 = vadd.f32 %v1355_v49, %v639_v8  ;;  %v543_v12 = vpop.f32.mrf.mxu1 }
 0x128   :  { %v909_v11 = vadd.f32 %v1347_v41, %v494_v9  ;;  %v910_v13 = vadd.f32 %v1349_v42, %v543_v12 }
 0x129   :  { %v942_v14 = vpack.c.bf16 %v908_v10, %v907_v7 }
 0x12a   :  { %v943_v15 = vpack.c.bf16 %v910_v13, %v909_v11 }
 0x12b   :  { %974 = vst [vmem:[#allocation9 + $0xe8] sm:$0xff] %v942_v14 }
 0x12c   :  { %975 = vst [vmem:[#allocation9 + $0xf0] sm:$0xff] %v943_v15 }
 0x12e   :  { %v592_v16 = vpop.f32.mrf.mxu2  ;;  %v641_v18 = vpop.f32.mrf.mxu3 }
 0x12f   :  { %v911_v17 = vadd.f32 %v1353_v48, %v592_v16  ;;  %v912_v19 = vadd.f32 %v1355_v49, %v641_v18 }
 0x131   :  { %v944_v41 = vpack.c.bf16 %v912_v19, %v911_v17 }
 0x133   :  { %976 = vst [vmem:[#allocation9 + $0xf8] sm:$0xff] %v944_v41 }
 0x134   :  { %989 = dma.vmem_to_hbm [thread:$0]  %s982_s29, 4096, %s984_s5, [#allocation5], %s1308_s20, %s1308_s20, %s1309_s21  }
 0x135   :  { %1305 = dma.done.wait [#allocation5], 4096  }
 0x136   :  { %1306 = vsyncadd [#allocation5], 4294963200 }
 0x137   :  { %994 = vsyncpa [#allocation4], 1 }
 0x138   :  { %995 = vsyncpa [#allocation7], 1 }
 0x139   :  { %996 = vsyncpa [#allocation5], 1 }

</bundles_post_ra>
